<compile_context>
chip_gen: v7x
topology: tpu7x:2x2x1
jax: 0.10.0
libtpu: 0.0.40
codegen_flags: <defaults>
</compile_context>

<pallas_src>
import functools

import jax
import jax.numpy as jnp
from jax.experimental import pallas as pl
from jax.experimental.pallas import tpu as pltpu

_LANES = 128          # vreg lane width == packing target for x
_TB_ROWS = 8192       # target packed rows per grid step (~4 MiB useful f32 x)


def _round_up(x, m):
    return ((x + m - 1) // m) * m


def _linreg_packed_kernel(x_ref, w_ref, b_ref, o_ref):
    """One batch tile, lane-packed.

    x_ref: (tb, 128)  VMEM -- 128//in samples per row, features contiguous
    w_ref: (128, C)   VMEM -- kron(I_{128//in}, W^T), block diagonal
    b_ref: (1, C)     VMEM -- bias tiled once per packed sample
    o_ref: (tb, C)         -- packed outputs; row r holds samples r*spr..r*spr+spr-1
    """
    y = jnp.dot(x_ref[...], w_ref[...], preferred_element_type=jnp.float32)
    o_ref[...] = (y + b_ref[...]).astype(o_ref.dtype)


@jax.jit
def _xla_linear(x, w, b):
    """Plain XLA fallback / epilogue path (full-precision contraction)."""
    return jnp.einsum("bi,oi->bo", x, w,
                      precision=jax.lax.Precision.HIGHEST) + b


@functools.partial(jax.jit, static_argnames=("tb_target",))
def linreg_pallas(x, w, b, *, tb_target=_TB_ROWS):
    """nn.Linear forward on the Pallas path; returns (B, out)."""
    B, in_f = x.shape
    out_f = w.shape[0]

    if _LANES % in_f != 0:
        # TODO(synk): generalize packing to lcm(in_f, 128); for now only
        # feature counts that tile the 128-lane vreg take the Pallas path.
        return _xla_linear(x, w, b)

    spr = _LANES // in_f                 # samples per packed row (32 at in=4)
    C = spr * out_f                      # packed output columns
    b_main = (B // spr) * spr            # samples that fill whole packed rows
    rows = b_main // spr

    if rows == 0:
        return _xla_linear(x, w, b)

    # Free contiguous repack (bitcast-style reshape; no jnp.pad copy of x).
    x_packed = x[:b_main].reshape(rows, _LANES)

    # Block-diagonal weight -> full K=128 MXU contraction.  Tiny: (128, C).
    w_kron = jnp.kron(jnp.eye(spr, dtype=w.dtype), w.T)
    b_packed = jnp.tile(b, spr).reshape(1, C)

    # Biggest tile under the VMEM budget, but keep >= 2 grid steps when there
    # is enough work so "parallel" can shard across v7x's two TensorCores.
    tb = min(tb_target, max(8, _round_up(pl.cdiv(rows, 2), 8)))
    nb = pl.cdiv(rows, tb)               # ragged last block is handled by Pallas

    # Double-buffered VMEM: packed-x tile + output tile (C lanes pad to 128)
    # + resident kron weight, plus slack for Mosaic scratch.  Clamp inside
    # v7x's 64 MiB physical VMEM; explicit limit also lifts v5e's 16 MiB
    # default scoped VMEM.
    c_pad = _round_up(C, _LANES)
    vmem_needed = 2 * (tb * _LANES + tb * c_pad + _LANES * c_pad) * 4 + (4 << 20)
    vmem_limit = int(min(48 << 20, max(24 << 20, vmem_needed)))

    y_packed = pl.pallas_call(
        _linreg_packed_kernel,
        out_shape=jax.ShapeDtypeStruct((rows, C), x.dtype),
        grid=(nb,),
        in_specs=[
            pl.BlockSpec((tb, _LANES), lambda i: (i, 0)),   # packed x tile
            pl.BlockSpec((_LANES, C), lambda i: (0, 0)),    # kron weight (resident)
            pl.BlockSpec((1, C), lambda i: (0, 0)),         # packed bias
        ],
        out_specs=pl.BlockSpec((tb, C), lambda i: (i, 0)),
        compiler_params=pltpu.CompilerParams(
            dimension_semantics=("parallel",),
            vmem_limit_bytes=vmem_limit,
        ),
    )(x_packed, w_kron, b_packed)

    # The packed layout inverts with a free reshape: (rows, spr*out) -> (b_main, out).
    y_main = y_packed.reshape(b_main, out_f)

    if b_main == B:
        return y_main
    # Tiny (< spr rows) XLA epilogue for the remainder instead of padding x.
    y_tail = _xla_linear(x[b_main:], w, b)
    return jnp.concatenate([y_main, y_tail], axis=0)


def linear_regression_forward(x, w, b):
    """LinearRegressionTorch.forward.  Dispatch on streamed bytes: the Pallas
    kernel only wins once the op is genuinely HBM-streaming bound."""
    b_rows, in_f = x.shape
    big_enough = x.size * x.dtype.itemsize >= (2 << 20)      # ~2 MiB of x
    packable = (_LANES % in_f == 0) and (b_rows >= _LANES // in_f)
    if big_enough and packable:
        return linreg_pallas(x, w, b)
    return _xla_linear(x, w, b)


if __name__ == "__main__":
    # Shapes implied by the module: input_size=4, output_size=1.  batch=256 is
    # the small demo shape (>= 32 so at least one lane-packed row exists).
    input_size, output_size, batch = 4, 1, 256

    key = jax.random.PRNGKey(0)
    kx, kw, kb, kx2 = jax.random.split(key, 4)

    bound = 1.0 / (input_size ** 0.5)

    # Round inputs/weights to the bf16 grid so the correctness check is
    # insensitive to MXU pass-count (precision) differences between the Pallas
    # kernel and the pure-VPU reference; the kernel itself stays plain f32.
    def _bf16_grid(a):
        return a.astype(jnp.bfloat16).astype(jnp.float32)

    x = _bf16_grid(jax.random.normal(kx, (batch, input_size), dtype=jnp.float32))
    w = _bf16_grid(jax.random.uniform(kw, (output_size, input_size),
                                      jnp.float32, -bound, bound))
    b = _bf16_grid(jax.random.uniform(kb, (output_size,),
                                      jnp.float32, -bound, bound))

    def reference(xx):
        # Exact f32 elementwise reference (no MXU involved).
        return jnp.sum(xx[:, None, :] * w[None, :, :], axis=-1) + b

    # 1) Run the Pallas kernel itself at the small demo shape (1-tile grid).
    y = linreg_pallas(x, w, b)
    jax.block_until_ready(y)
    assert y.shape == (batch, output_size)
    assert jnp.allclose(y, reference(x), atol=1e-5, rtol=1e-5), "small-batch mismatch"

    # 2) Streaming path: multi-tile "parallel" grid with a ragged last block.
    big = 300_000                        # 300000 % 32 == 0 -> 9375 packed rows
    x_big = _bf16_grid(jax.random.normal(kx2, (big, input_size), dtype=jnp.float32))
    y_big = linear_regression_forward(x_big, w, b)
    jax.block_until_ready(y_big)
    assert y_big.shape == (big, output_size)
    assert jnp.allclose(y_big, reference(x_big), atol=1e-5, rtol=1e-5), "big-batch mismatch"

    print("KERNEL_OK")
</pallas_src>

<mosaic_0001>
module attributes {stable_mosaic.version = 11 : i64} {
  func.func @_linreg_packed_kernel(%arg0: i32, %arg1: memref<8x128xf32, #tpu.memory_space<vmem>>, %arg2: memref<128x32xf32, #tpu.memory_space<vmem>>, %arg3: memref<1x32xf32, #tpu.memory_space<vmem>>, %arg4: memref<8x32xf32, #tpu.memory_space<vmem>>) attributes {dimension_semantics = [#tpu.dimension_semantics<parallel>], iteration_bounds = array<i64: 1>, scalar_prefetch = 0 : i64, scratch_operands = 0 : i64, tpu.core_type = #tpu.core_type<tc>, window_params = [{transform_indices = @transform_0, window_bounds = array<i64: 8, 128>}, {pipeline_mode = #tpu.pipeline_mode<synchronous>, transform_indices = @transform_1, window_bounds = array<i64: 128, 32>}, {pipeline_mode = #tpu.pipeline_mode<synchronous>, transform_indices = @transform_2, window_bounds = array<i64: 1, 32>}, {transform_indices = @transform_3, window_bounds = array<i64: 8, 32>}]} {
    %c0 = arith.constant 0 : index
    %c0_0 = arith.constant 0 : index
    %0 = vector.load %arg1[%c0, %c0_0] : memref<8x128xf32, #tpu.memory_space<vmem>>, vector<8x128xf32>
    %c0_1 = arith.constant 0 : index
    %c0_2 = arith.constant 0 : index
    %1 = vector.load %arg2[%c0_1, %c0_2] : memref<128x32xf32, #tpu.memory_space<vmem>>, vector<128x32xf32>
    %cst = arith.constant dense<0.000000e+00> : vector<8x32xf32>
    %2 = tpu.matmul %0, %1, %cst {dimension_numbers = #tpu.dot_dimension_numbers<[1], [0], [0], [1], [0, 0, 1, 1], [], []>} : vector<8x128xf32>, vector<128x32xf32>, vector<8x32xf32> -> vector<8x32xf32>
    %c0_3 = arith.constant 0 : index
    %c0_4 = arith.constant 0 : index
    %3 = vector.load %arg3[%c0_3, %c0_4] : memref<1x32xf32, #tpu.memory_space<vmem>>, vector<1x32xf32>
    %4 = vector.broadcast %3 : vector<1x32xf32> to vector<8x32xf32>
    %5 = arith.addf %2, %4 : vector<8x32xf32>
    %c0_5 = arith.constant 0 : index
    %c0_6 = arith.constant 0 : index
    %6 = vector.load %arg4[%c0_5, %c0_6] : memref<8x32xf32, #tpu.memory_space<vmem>>, vector<8x32xf32>
    tpu.vector_store %arg4[%c0_5, %c0_6], %5 {strides = array<i32>} : memref<8x32xf32, #tpu.memory_space<vmem>>, vector<8x32xf32>,
    return
  }
  func.func @transform_0(%arg0: i32) -> (i32, i32) {
    %c0_i32 = arith.constant 0 : i32
    %c0_i32_0 = arith.constant 0 : i32
    return %arg0, %c0_i32 : i32, i32
  }
  func.func @transform_1(%arg0: i32) -> (i32, i32) {
    %c0_i32 = arith.constant 0 : i32
    %c0_i32_0 = arith.constant 0 : i32
    %c0_i32_1 = arith.constant 0 : i32
    return %c0_i32, %c0_i32_0 : i32, i32
  }
  func.func @transform_2(%arg0: i32) -> (i32, i32) {
    %c0_i32 = arith.constant 0 : i32
    %c0_i32_0 = arith.constant 0 : i32
    %c0_i32_1 = arith.constant 0 : i32
    return %c0_i32, %c0_i32_0 : i32, i32
  }
  func.func @transform_3(%arg0: i32) -> (i32, i32) {
    %c0_i32 = arith.constant 0 : i32
    %c0_i32_0 = arith.constant 0 : i32
    return %arg0, %c0_i32 : i32, i32
  }
}

</mosaic_0001>

<bundles_post_ra>
// kernel: linreg_pallas.1
= control target key start
LH: loop header
LB: loop body
LE: loop exit
PB: predicated region body
PF: predicated region fallthrough
CT: control target
= control target key end

     0   :  { %v194_v0 = vmov 0.0|0.0   ;;  %vm195_vm0 = vmmov 0   ;;  %v196_v4 = vmov 0.0   ;;  %vm108_vm1 = vcmask 261120   ;;  %s274_s1 = inlined_call_operand.vmem [shape: f32[128,32], index: 1, kind: input, shape index: {}]   ;;  %s275_s0 = inlined_call_operand.vmem [shape: f32[8,128], index: 0, kind: input, shape index: {}]   ;;  %s276_s2 = inlined_call_operand.vmem [shape: f32[1,32], index: 2, kind: input, shape index: {}]   ;;  %s277_s3 = inlined_call_operand.vmem [shape: f32[8,32], index: 3, kind: output, shape index: {}]  }
   0x1   :  { %167 = vmatprep.subr.bf16.mxu0 %v194_v0  ;;  %v15_v1 = vld [vmem:[%s274_s1] sm:$0xff]  ;;  %v16_v2 = vld [vmem:[%s274_s1 + $0x8] sm:$0xff]  ;;  %v17_v3 = vld [vmem:[%s274_s1 + $0x10] sm:$0xff]  ;;  %164 = vmatprep.mubr.msk.f32.mxu0 %vm195_vm0, %v196_v4 }
   0x2   :  { %v168_v5 = vpack.c.bf16 %v16_v2, %v15_v1  ;;  %v18_v6 = vld [vmem:[%s274_s1 + $0x18] sm:$0xff]  ;;  %v19_v8 = vld [vmem:[%s274_s1 + $0x20] sm:$0xff]  ;;  %v20_v9 = vld [vmem:[%s274_s1 + $0x28] sm:$0xff] }
   0x3   :  { %v171_v7 = vpack.c.bf16 %v18_v6, %v17_v3  ;;  %v174_v10 = vpack.c.bf16 %v20_v9, %v19_v8  ;;  %v21_v11 = vld [vmem:[%s274_s1 + $0x30] sm:$0xff]  ;;  %v22_v12 = vld [vmem:[%s274_s1 + $0x38] sm:$0xff]  ;;  %v23_v14 = vld [vmem:[%s274_s1 + $0x40] sm:$0xff] }
   0x4   :  { %169 = vmatpush3.bf16.msra.mxu0 %v168_v5  ;;  %v177_v13 = vpack.c.bf16 %v22_v12, %v21_v11  ;;  %v24_v15 = vld [vmem:[%s274_s1 + $0x48] sm:$0xff]  ;;  %v25_v17 = vld [vmem:[%s274_s1 + $0x50] sm:$0xff]  ;;  %v26_v18 = vld [vmem:[%s274_s1 + $0x58] sm:$0xff] }
   0x5   :  { %170 = vmatprep.subr.bf16.mxu0 %v194_v0  ;;  %v180_v16 = vpack.c.bf16 %v24_v15, %v23_v14  ;;  %v183_v19 = vpack.c.bf16 %v26_v18, %v25_v17  ;;  %v27_v20 = vld [vmem:[%s274_s1 + $0x60] sm:$0xff]  ;;  %v28_v21 = vld [vmem:[%s274_s1 + $0x68] sm:$0xff]  ;;  %v29_v23 = vld [vmem:[%s274_s1 + $0x70] sm:$0xff] }
   0x6   :  { %v186_v22 = vpack.c.bf16 %v28_v21, %v27_v20  ;;  %v30_v24 = vld [vmem:[%s274_s1 + $0x78] sm:$0xff]  ;;  %v14_v26 = vld [vmem:[%s275_s0] sm:$0xff] }
   0x7   :  { %v189_v25 = vpack.c.bf16 %v30_v24, %v29_v23  ;;  %v114_v27 = vld [vmem:[%s276_s2] ss:$0 sm:$0xff] }
   0x8   :  { %172 = vmatpush3.bf16.msra.mxu0 %v171_v7 }
   0x9   :  { %173 = vmatprep.subr.bf16.mxu0 %v194_v0 }
   0xc   :  { %175 = vmatpush3.bf16.msra.mxu0 %v174_v10 }
   0xd   :  { %176 = vmatprep.subr.bf16.mxu0 %v194_v0 }
  0x10   :  { %178 = vmatpush3.bf16.msra.mxu0 %v177_v13 }
  0x11   :  { %179 = vmatprep.subr.bf16.mxu0 %v194_v0 }
  0x14   :  { %181 = vmatpush3.bf16.msra.mxu0 %v180_v16 }
  0x15   :  { %182 = vmatprep.subr.bf16.mxu0 %v194_v0 }
  0x18   :  { %184 = vmatpush3.bf16.msra.mxu0 %v183_v19 }
  0x19   :  { %185 = vmatprep.subr.bf16.mxu0 %v194_v0 }
  0x1c   :  { %187 = vmatpush3.bf16.msra.mxu0 %v186_v22 }
  0x1d   :  { %188 = vmatprep.subr.bf16.mxu0 %v194_v0 }
  0x20   :  { %190 = vmatpush3.bf16.msra.mxu0 %v189_v25 }
  0x23   :  { %165 = vmatmul.mubr.f32.vlgmr.msra.gmra.mrb[0].mxu0 %v14_v26 }
  0xf6   :  { %v104_v28 = vpop.f32.mrb[0].mxu0 }
  0xf7   :  { %v105_v29 = vadd.f32 %v114_v27, %v104_v28  ;;  %v166_v30 = vpop.f32.mrb[1].mxu0 }
  0xf9   :  { %109 = vst.msk [vmem:[%s277_s3] sm:$0xff] %vm108_vm1, %v105_v29 }

</bundles_post_ra>
